<compile_context>
chip_gen: v7x
topology: tpu7x:2x2x1
jax: 0.10.0
libtpu: 0.0.40
codegen_flags: <defaults>
</compile_context>

<pallas_src>
import functools

import jax
import jax.numpy as jnp
from jax.experimental import pallas as pl
from jax.experimental.pallas import tpu as pltpu


def _facial_block_kernel(h_ref, xs_ref, wd_ref, wp_ref, bp_ref, alpha_ref,
                         o_ref, *, stride, ksize, cin, cout, wo, g):
    """All refs are in the fused (W*C)-on-lanes layout.

    h_ref    : (P, th + halo, Wh*Cin)  P=1 (stride 1) or 4 parity grids (stride 2)
    xs_ref   : (P, th, wo*Cout)        skip path (channel padded; pre-pool parities)
    wd_ref   : (K*K, wo*Cin)           depthwise taps tiled over the fused lane dim
    wp_ref   : (g*Cin, g*Cout)         group-block-diagonal pointwise weight
    bp_ref   : (1, wo*Cout)            folded (depthwise + pointwise) bias, tiled
    alpha_ref: (1, wo*Cout)            PReLU slope, tiled
    o_ref    : (th, wo*Cout)           lane-dense output slab
    """
    th = o_ref.shape[0]
    w_dw = wd_ref[...]                       # load all K*K taps once per grid step

    # ---- depthwise KxK conv, dx-outermost: one lane realign per dx, cheap
    # static sublane slices per dy.
    acc = jnp.zeros((th, wo * cin), jnp.float32)
    if stride == 1:
        for dx in range(ksize):
            slab = h_ref[0, :, dx * cin:(dx + wo) * cin]            # (th+K-1, wo*cin)
            for dy in range(ksize):
                tap = w_dw[dy * ksize + dx:dy * ksize + dx + 1, :]   # (1, wo*cin)
                acc = acc + slab[dy:dy + th, :] * tap
    else:  # stride == 2: work on the 4 (row,col)-parity sub-grids
        for dx in range(ksize):
            q, ox = dx % 2, dx // 2
            for p in range(2):
                slab = h_ref[2 * p + q, :, ox * cin:(ox + wo) * cin]  # (th+1, wo*cin)
                for dy in range(p, ksize, 2):
                    oy = dy // 2
                    tap = w_dw[dy * ksize + dx:dy * ksize + dx + 1, :]
                    acc = acc + slab[oy:oy + th, :] * tap
    # depthwise bias is folded into bp_ref (see prepare_params), no add here.

    # ---- skip path (channel pad done in wrapper; 2x2 maxpool = max of parities)
    if stride == 2:
        xs = jnp.maximum(jnp.maximum(xs_ref[0], xs_ref[1]),
                         jnp.maximum(xs_ref[2], xs_ref[3]))
    else:
        xs = xs_ref[0]

    bp = bp_ref[...]
    alpha = alpha_ref[...]
    wp = wp_ref[...]

    # ---- pointwise 1x1 conv on the MXU, one lane group (g columns of W) at a
    # time: (th, g*cin) @ (g*cin, g*cout) -> (th, g*cout), stays lane-fused.
    ngrp = wo // g
    for grp in range(ngrp):
        a_grp = acc[:, grp * g * cin:(grp + 1) * g * cin]
        y = jnp.dot(a_grp.astype(wp.dtype), wp,
                    preferred_element_type=jnp.float32)
        cs, ce = grp * g * cout, (grp + 1) * g * cout
        z = y + bp[:, cs:ce] + xs[:, cs:ce]
        a_slope = alpha[:, cs:ce]
        o_ref[:, cs:ce] = jnp.where(z >= 0, z, a_slope * z).astype(o_ref.dtype)


def _pick_group(wo, cin, lane_target):
    """Smallest divisor g of wo with g*cin >= lane_target (else the whole wo)."""
    for d in range(1, wo + 1):
        if wo % d == 0 and d * cin >= lane_target:
            return d
    return wo


def prepare_params(params, *, wo, ksize=3, lane_target=128, use_bf16_matmul=False):
    """One-time (per model) weight/bias layout prep for the fused lane layout.

    lane_target: 128 (v5e) or 256 (v6e/v7x) — sets the MXU group size.
    use_bf16_matmul: bf16 pointwise weights + bf16-cast activations on the MXU
      (recommended on v6e/v7x; keep False for a tight f32 reference match).
    """
    wd, bd, wp, bp, alpha = params  # torch shapes: (Cin,1,K,K),(Cin,),(Cout,Cin,1,1),(Cout,),(Cout,)
    cin = wd.shape[0]
    cout = wp.shape[0]
    g = _pick_group(wo, cin, lane_target)

    wp2 = jnp.transpose(wp[:, :, 0, 0], (1, 0)).astype(jnp.float32)        # (Cin, Cout)
    # fold depthwise bias: (acc + bd) @ Wp + bp == acc @ Wp + (bd @ Wp + bp)
    bp_fold = bd.astype(jnp.float32) @ wp2 + bp.astype(jnp.float32)        # (Cout,)

    # depthwise taps tiled over the fused (W*Cin) lane dim: row = dy*K + dx
    wd_taps = jnp.transpose(wd[:, 0, :, :], (1, 2, 0)).reshape(ksize * ksize, cin)
    wd_k = jnp.tile(wd_taps, (1, wo)).astype(jnp.float32)                  # (K*K, wo*Cin)

    # group-block-diagonal pointwise weight (shared across all wo/g groups)
    wp_grp = jnp.kron(jnp.eye(g, dtype=jnp.float32), wp2)                  # (g*Cin, g*Cout)
    if use_bf16_matmul:
        wp_grp = wp_grp.astype(jnp.bfloat16)

    bp_k = jnp.tile(bp_fold, wo).reshape(1, wo * cout)                     # (1, wo*Cout)
    a_k = jnp.tile(alpha.astype(jnp.float32), wo).reshape(1, wo * cout)
    return dict(wd=wd_k, wp=wp_grp, bp=bp_k, alpha=a_k,
                g=g, cin=cin, cout=cout, ksize=ksize, wo=wo)


def facial_lm_basic_block(x_nchw, prepped, *, stride=1, th=None):
    """Forward pass of FacialLMBasicBlock. x_nchw: (N, Cin, H, W) float32.

    th: output rows per grid step (H tile). Must divide H_out. Default: whole H.
    """
    wd_k, wp_grp = prepped["wd"], prepped["wp"]
    bp_k, a_k = prepped["bp"], prepped["alpha"]
    g, cin, cout = prepped["g"], prepped["cin"], prepped["cout"]
    ksize, wo = prepped["ksize"], prepped["wo"]

    n, xcin, hin, win = x_nchw.shape
    assert xcin == cin
    if stride == 2:
        assert hin % 2 == 0 and win % 2 == 0, "stride=2 path assumes even H, W"
        ho, wo_chk = hin // 2, win // 2
    else:
        ho, wo_chk = hin, win
    assert wo_chk == wo, "prepare_params(wo=...) must match the input width"

    if th is None:
        th = ho
    assert ho % th == 0, "H tile must divide the output height"
    n_ht = ho // th

    x = jnp.transpose(x_nchw, (0, 2, 3, 1)).astype(jnp.float32)            # NHWC

    # ---- main branch: pad, (stride 2) parity deinterleave, H tiles with halo,
    #      fuse W*Cin onto the lane axis
    if stride == 2:
        hpad = jnp.pad(x, ((0, 0), (0, 2), (0, 2), (0, 0)))
        parts = [hpad[:, p::2, q::2, :].reshape(n, ho + 1, (wo + 1) * cin)
                 for p in (0, 1) for q in (0, 1)]
        par = jnp.stack(parts, axis=1)                                     # (n,4,ho+1,(wo+1)*cin)
        h_f = jnp.stack([par[:, :, t * th:t * th + th + 1, :]
                         for t in range(n_ht)], axis=1)                    # (n,n_ht,4,th+1,...)
        n_par, rows_h, cols_h = 4, th + 1, (wo + 1) * cin
    else:
        pad = (ksize - 1) // 2
        hpad = jnp.pad(x, ((0, 0), (pad, pad), (pad, pad), (0, 0)))
        hp = hpad.reshape(n, hin + 2 * pad, (win + 2 * pad) * cin)
        h_f = jnp.stack([hp[:, t * th:t * th + th + ksize - 1, :]
                         for t in range(n_ht)], axis=1)[:, :, None, :, :]  # (n,n_ht,1,th+K-1,...)
        n_par, rows_h, cols_h = 1, th + ksize - 1, (win + 2 * pad) * cin

    # ---- skip branch: channel pad (zero pad commutes with the max-pool since
    #      max over zeros is zero), (stride 2) parity split, H tiles (no halo)
    xs = x
    if cout > cin:
        xs = jnp.pad(xs, ((0, 0), (0, 0), (0, 0), (0, cout - cin)))
    if stride == 2:
        xparts = [xs[:, p::2, q::2, :].reshape(n, ho, wo * cout)
                  for p in (0, 1) for q in (0, 1)]
        xsp = jnp.stack(xparts, axis=1)                                    # (n,4,ho,wo*cout)
        xs_f = xsp.reshape(n, 4, n_ht, th, wo * cout).transpose(0, 2, 1, 3, 4)
    else:
        xs_f = xs.reshape(n, n_ht, th, wo * cout)[:, :, None, :, :]

    kern = functools.partial(_facial_block_kernel, stride=stride, ksize=ksize,
                             cin=cin, cout=cout, wo=wo, g=g)

    flops = 2 * n * ho * wo * cin * (ksize * ksize + g * cout)
    bytes_accessed = (int(h_f.size + xs_f.size + n * ho * wo * cout
                          + wd_k.size + bp_k.size + a_k.size) * 4
                      + int(wp_grp.size) * wp_grp.dtype.itemsize)

    out = pl.pallas_call(
        kern,
        out_shape=jax.ShapeDtypeStruct((n, n_ht, th, wo * cout), jnp.float32),
        grid=(n, n_ht),
        in_specs=[
            pl.BlockSpec((None, None, n_par, rows_h, cols_h),
                         lambda i, t: (i, t, 0, 0, 0)),
            pl.BlockSpec((None, None, n_par, th, wo * cout),
                         lambda i, t: (i, t, 0, 0, 0)),
            pl.BlockSpec((ksize * ksize, wo * cin), lambda i, t: (0, 0)),
            pl.BlockSpec((g * cin, g * cout), lambda i, t: (0, 0)),
            pl.BlockSpec((1, wo * cout), lambda i, t: (0, 0)),
            pl.BlockSpec((1, wo * cout), lambda i, t: (0, 0)),
        ],
        out_specs=pl.BlockSpec((None, None, th, wo * cout),
                               lambda i, t: (i, t, 0, 0)),
        compiler_params=pltpu.CompilerParams(
            dimension_semantics=("parallel", "parallel"),   # batch and H tiles
            vmem_limit_bytes=32 * 1024 * 1024),
        cost_estimate=pl.CostEstimate(flops=int(flops), transcendentals=0,
                                      bytes_accessed=int(bytes_accessed)),
    )(h_f, xs_f, wd_k, wp_grp, bp_k, a_k)

    out = out.reshape(n, ho, wo, cout)
    return jnp.transpose(out, (0, 3, 1, 2))                 # back to NCHW


# ----------------------------- reference & init -----------------------------

def _reference(x_nchw, params, *, stride=1, ksize=3):
    """Plain-JAX (XLA conv) reference mirroring the PyTorch forward exactly."""
    wd, bd, wp, bp, alpha = params
    n, cin, hin, win = x_nchw.shape
    cout = wp.shape[0]
    if stride == 2:
        h = jnp.pad(x_nchw, ((0, 0), (0, 0), (0, 2), (0, 2)))
        pad = [(0, 0), (0, 0)]
        xp = x_nchw.reshape(n, cin, hin // 2, 2, win // 2, 2).max(axis=(3, 5))
    else:
        p = (ksize - 1) // 2
        h = x_nchw
        pad = [(p, p), (p, p)]
        xp = x_nchw
    if cout > cin:
        xp = jnp.pad(xp, ((0, 0), (0, cout - cin), (0, 0), (0, 0)))
    y = jax.lax.conv_general_dilated(
        h, wd, (stride, stride), pad,
        dimension_numbers=("NCHW", "OIHW", "NCHW"),
        feature_group_count=cin) + bd.reshape(1, cin, 1, 1)
    y = jax.lax.conv_general_dilated(
        y, wp, (1, 1), [(0, 0), (0, 0)],
        dimension_numbers=("NCHW", "OIHW", "NCHW")) + bp.reshape(1, cout, 1, 1)
    z = y + xp
    a = alpha.reshape(1, cout, 1, 1)
    return jnp.where(z >= 0, z, a * z)


def _make_params(key, cin, cout, ksize=3):
    ks = jax.random.split(key, 5)
    wd = 0.2 * jax.random.normal(ks[0], (cin, 1, ksize, ksize), jnp.float32)
    bd = 0.1 * jax.random.normal(ks[1], (cin,), jnp.float32)
    wp = 0.2 * jax.random.normal(ks[2], (cout, cin, 1, 1), jnp.float32)
    bp = 0.1 * jax.random.normal(ks[3], (cout,), jnp.float32)
    alpha = 0.25 + 0.05 * jax.random.normal(ks[4], (cout,), jnp.float32)
    return (wd, bd, wp, bp, alpha)


if __name__ == "__main__":
    key = jax.random.PRNGKey(0)
    kx1, kp1, kx2, kp2 = jax.random.split(key, 4)

    # stride=1 block with channel padding (in=4 -> out=8), 16x16 spatial,
    # H tiled into 2 "parallel" grid steps of 8 output rows each.
    x1 = jax.random.normal(kx1, (2, 4, 16, 16), jnp.float32)
    p1 = _make_params(kp1, 4, 8)
    prep1 = prepare_params(p1, wo=16, ksize=3)               # once per model
    fwd1 = jax.jit(lambda x: facial_lm_basic_block(x, prep1, stride=1, th=8))
    out1 = jax.block_until_ready(fwd1(x1))
    ref1 = _reference(x1, p1, stride=1)
    assert out1.shape == (2, 8, 16, 16)
    assert float(jnp.max(jnp.abs(out1 - ref1))) < 1e-4

    # stride=2 downsampling block (in=8 -> out=16), 16x16 -> 8x8
    x2 = jax.random.normal(kx2, (2, 8, 16, 16), jnp.float32)
    p2 = _make_params(kp2, 8, 16)
    prep2 = prepare_params(p2, wo=8, ksize=3)                # once per model
    fwd2 = jax.jit(lambda x: facial_lm_basic_block(x, prep2, stride=2, th=8))
    out2 = jax.block_until_ready(fwd2(x2))
    ref2 = _reference(x2, p2, stride=2)
    assert out2.shape == (2, 16, 8, 8)
    assert float(jnp.max(jnp.abs(out2 - ref2))) < 1e-4

    # bf16-MXU path (recommended production default on v6e/v7x) — looser
    # tolerance since activations are bf16-cast before the MXU.
    prep1b = prepare_params(p1, wo=16, ksize=3, use_bf16_matmul=True)
    out1b = jax.block_until_ready(
        facial_lm_basic_block(x1, prep1b, stride=1, th=8))
    assert float(jnp.max(jnp.abs(out1b - ref1))) < 5e-2

    print("KERNEL_OK")
</pallas_src>

<mosaic_0001>
module attributes {stable_mosaic.version = 11 : i64} {
  func.func @_facial_block_kernel(%arg0: i32, %arg1: i32, %arg2: memref<1x1x1x10x72xf32, #tpu.memory_space<vmem>>, %arg3: memref<1x1x1x8x128xf32, #tpu.memory_space<vmem>>, %arg4: memref<9x64xf32, #tpu.memory_space<vmem>>, %arg5: memref<64x128xf32, #tpu.memory_space<vmem>>, %arg6: memref<1x128xf32, #tpu.memory_space<vmem>>, %arg7: memref<1x128xf32, #tpu.memory_space<vmem>>, %arg8: memref<1x1x8x128xf32, #tpu.memory_space<vmem>>) attributes {dimension_semantics = [#tpu.dimension_semantics<parallel>, #tpu.dimension_semantics<parallel>], iteration_bounds = array<i64: 2, 2>, scalar_prefetch = 0 : i64, scratch_operands = 0 : i64, tpu.core_type = #tpu.core_type<tc>, window_params = [{transform_indices = @transform_0, window_bounds = array<i64: 1, 1, 1, 10, 72>}, {transform_indices = @transform_1, window_bounds = array<i64: 1, 1, 1, 8, 128>}, {pipeline_mode = #tpu.pipeline_mode<synchronous>, transform_indices = @transform_2, window_bounds = array<i64: 9, 64>}, {pipeline_mode = #tpu.pipeline_mode<synchronous>, transform_indices = @transform_3, window_bounds = array<i64: 64, 128>}, {pipeline_mode = #tpu.pipeline_mode<synchronous>, transform_indices = @transform_4, window_bounds = array<i64: 1, 128>}, {pipeline_mode = #tpu.pipeline_mode<synchronous>, transform_indices = @transform_5, window_bounds = array<i64: 1, 128>}, {transform_indices = @transform_6, window_bounds = array<i64: 1, 1, 8, 128>}]} {
    %c0 = arith.constant 0 : index
    %c0_0 = arith.constant 0 : index
    %0 = vector.load %arg4[%c0, %c0_0] : memref<9x64xf32, #tpu.memory_space<vmem>>, vector<9x64xf32>
    %cst = arith.constant 0.000000e+00 : f32
    %1 = vector.broadcast %cst : f32 to vector<8x64xf32>
    %c0_1 = arith.constant 0 : index
    %c0_2 = arith.constant 0 : index
    %c0_3 = arith.constant 0 : index
    %c0_4 = arith.constant 0 : index
    %c0_5 = arith.constant 0 : index
    %2 = vector.load %arg2[%c0_1, %c0_2, %c0_3, %c0_4, %c0_5] : memref<1x1x1x10x72xf32, #tpu.memory_space<vmem>>, vector<1x1x1x10x64xf32>
    %3 = vector.shape_cast %2 : vector<1x1x1x10x64xf32> to vector<10x64xf32>
    %4 = vector.extract_strided_slice %0 {offsets = [0, 0], sizes = [1, 64], strides = [1, 1]} : vector<9x64xf32> to vector<1x64xf32>
    %5 = vector.extract_strided_slice %3 {offsets = [0, 0], sizes = [8, 64], strides = [1, 1]} : vector<10x64xf32> to vector<8x64xf32>
    %6 = vector.broadcast %4 : vector<1x64xf32> to vector<8x64xf32>
    %7 = arith.mulf %5, %6 : vector<8x64xf32>
    %8 = arith.addf %1, %7 : vector<8x64xf32>
    %9 = vector.extract_strided_slice %0 {offsets = [3, 0], sizes = [1, 64], strides = [1, 1]} : vector<9x64xf32> to vector<1x64xf32>
    %10 = vector.extract_strided_slice %3 {offsets = [1, 0], sizes = [8, 64], strides = [1, 1]} : vector<10x64xf32> to vector<8x64xf32>
    %11 = vector.broadcast %9 : vector<1x64xf32> to vector<8x64xf32>
    %12 = arith.mulf %10, %11 : vector<8x64xf32>
    %13 = arith.addf %8, %12 : vector<8x64xf32>
    %14 = vector.extract_strided_slice %0 {offsets = [6, 0], sizes = [1, 64], strides = [1, 1]} : vector<9x64xf32> to vector<1x64xf32>
    %15 = vector.extract_strided_slice %3 {offsets = [2, 0], sizes = [8, 64], strides = [1, 1]} : vector<10x64xf32> to vector<8x64xf32>
    %16 = vector.broadcast %14 : vector<1x64xf32> to vector<8x64xf32>
    %17 = arith.mulf %15, %16 : vector<8x64xf32>
    %18 = arith.addf %13, %17 : vector<8x64xf32>
    %c0_6 = arith.constant 0 : index
    %c0_7 = arith.constant 0 : index
    %c0_8 = arith.constant 0 : index
    %c0_9 = arith.constant 0 : index
    %c4 = arith.constant 4 : index
    %19 = vector.load %arg2[%c0_6, %c0_7, %c0_8, %c0_9, %c4] : memref<1x1x1x10x72xf32, #tpu.memory_space<vmem>>, vector<1x1x1x10x64xf32>
    %20 = vector.shape_cast %19 : vector<1x1x1x10x64xf32> to vector<10x64xf32>
    %21 = vector.extract_strided_slice %0 {offsets = [1, 0], sizes = [1, 64], strides = [1, 1]} : vector<9x64xf32> to vector<1x64xf32>
    %22 = vector.extract_strided_slice %20 {offsets = [0, 0], sizes = [8, 64], strides = [1, 1]} : vector<10x64xf32> to vector<8x64xf32>
    %23 = vector.broadcast %21 : vector<1x64xf32> to vector<8x64xf32>
    %24 = arith.mulf %22, %23 : vector<8x64xf32>
    %25 = arith.addf %18, %24 : vector<8x64xf32>
    %26 = vector.extract_strided_slice %0 {offsets = [4, 0], sizes = [1, 64], strides = [1, 1]} : vector<9x64xf32> to vector<1x64xf32>
    %27 = vector.extract_strided_slice %20 {offsets = [1, 0], sizes = [8, 64], strides = [1, 1]} : vector<10x64xf32> to vector<8x64xf32>
    %28 = vector.broadcast %26 : vector<1x64xf32> to vector<8x64xf32>
    %29 = arith.mulf %27, %28 : vector<8x64xf32>
    %30 = arith.addf %25, %29 : vector<8x64xf32>
    %31 = vector.extract_strided_slice %0 {offsets = [7, 0], sizes = [1, 64], strides = [1, 1]} : vector<9x64xf32> to vector<1x64xf32>
    %32 = vector.extract_strided_slice %20 {offsets = [2, 0], sizes = [8, 64], strides = [1, 1]} : vector<10x64xf32> to vector<8x64xf32>
    %33 = vector.broadcast %31 : vector<1x64xf32> to vector<8x64xf32>
    %34 = arith.mulf %32, %33 : vector<8x64xf32>
    %35 = arith.addf %30, %34 : vector<8x64xf32>
    %c0_10 = arith.constant 0 : index
    %c0_11 = arith.constant 0 : index
    %c0_12 = arith.constant 0 : index
    %c0_13 = arith.constant 0 : index
    %c8 = arith.constant 8 : index
    %36 = vector.load %arg2[%c0_10, %c0_11, %c0_12, %c0_13, %c8] : memref<1x1x1x10x72xf32, #tpu.memory_space<vmem>>, vector<1x1x1x10x64xf32>
    %37 = vector.shape_cast %36 : vector<1x1x1x10x64xf32> to vector<10x64xf32>
    %38 = vector.extract_strided_slice %0 {offsets = [2, 0], sizes = [1, 64], strides = [1, 1]} : vector<9x64xf32> to vector<1x64xf32>
    %39 = vector.extract_strided_slice %37 {offsets = [0, 0], sizes = [8, 64], strides = [1, 1]} : vector<10x64xf32> to vector<8x64xf32>
    %40 = vector.broadcast %38 : vector<1x64xf32> to vector<8x64xf32>
    %41 = arith.mulf %39, %40 : vector<8x64xf32>
    %42 = arith.addf %35, %41 : vector<8x64xf32>
    %43 = vector.extract_strided_slice %0 {offsets = [5, 0], sizes = [1, 64], strides = [1, 1]} : vector<9x64xf32> to vector<1x64xf32>
    %44 = vector.extract_strided_slice %37 {offsets = [1, 0], sizes = [8, 64], strides = [1, 1]} : vector<10x64xf32> to vector<8x64xf32>
    %45 = vector.broadcast %43 : vector<1x64xf32> to vector<8x64xf32>
    %46 = arith.mulf %44, %45 : vector<8x64xf32>
    %47 = arith.addf %42, %46 : vector<8x64xf32>
    %48 = vector.extract_strided_slice %0 {offsets = [8, 0], sizes = [1, 64], strides = [1, 1]} : vector<9x64xf32> to vector<1x64xf32>
    %49 = vector.extract_strided_slice %37 {offsets = [2, 0], sizes = [8, 64], strides = [1, 1]} : vector<10x64xf32> to vector<8x64xf32>
    %50 = vector.broadcast %48 : vector<1x64xf32> to vector<8x64xf32>
    %51 = arith.mulf %49, %50 : vector<8x64xf32>
    %52 = arith.addf %47, %51 : vector<8x64xf32>
    %c0_14 = arith.constant 0 : index
    %c0_15 = arith.constant 0 : index
    %c0_16 = arith.constant 0 : index
    %c0_17 = arith.constant 0 : index
    %c0_18 = arith.constant 0 : index
    %53 = vector.load %arg3[%c0_14, %c0_15, %c0_16, %c0_17, %c0_18] : memref<1x1x1x8x128xf32, #tpu.memory_space<vmem>>, vector<1x1x1x8x128xf32>
    %54 = vector.shape_cast %53 : vector<1x1x1x8x128xf32> to vector<8x128xf32>
    %c0_19 = arith.constant 0 : index
    %c0_20 = arith.constant 0 : index
    %55 = vector.load %arg6[%c0_19, %c0_20] : memref<1x128xf32, #tpu.memory_space<vmem>>, vector<1x128xf32>
    %c0_21 = arith.constant 0 : index
    %c0_22 = arith.constant 0 : index
    %56 = vector.load %arg7[%c0_21, %c0_22] : memref<1x128xf32, #tpu.memory_space<vmem>>, vector<1x128xf32>
    %c0_23 = arith.constant 0 : index
    %c0_24 = arith.constant 0 : index
    %57 = vector.load %arg5[%c0_23, %c0_24] : memref<64x128xf32, #tpu.memory_space<vmem>>, vector<64x128xf32>
    %cst_25 = arith.constant dense<0.000000e+00> : vector<8x128xf32>
    %58 = tpu.matmul %52, %57, %cst_25 {dimension_numbers = #tpu.dot_dimension_numbers<[1], [0], [0], [1], [0, 0, 1, 1], [], []>} : vector<8x64xf32>, vector<64x128xf32>, vector<8x128xf32> -> vector<8x128xf32>
    %59 = vector.broadcast %55 : vector<1x128xf32> to vector<8x128xf32>
    %60 = arith.addf %58, %59 : vector<8x128xf32>
    %61 = arith.addf %60, %54 : vector<8x128xf32>
    %cst_26 = arith.constant 0.000000e+00 : f32
    %62 = vector.broadcast %cst_26 : f32 to vector<8x128xf32>
    %63 = arith.cmpf oge, %61, %62 : vector<8x128xf32>
    %64 = vector.broadcast %56 : vector<1x128xf32> to vector<8x128xf32>
    %65 = arith.mulf %64, %61 : vector<8x128xf32>
    %66 = arith.select %63, %61, %65 : vector<8x128xi1>, vector<8x128xf32>
    %c0_27 = arith.constant 0 : index
    %c0_28 = arith.constant 0 : index
    %c0_29 = arith.constant 0 : index
    %c0_30 = arith.constant 0 : index
    %67 = vector.load %arg8[%c0_27, %c0_28, %c0_29, %c0_30] : memref<1x1x8x128xf32, #tpu.memory_space<vmem>>, vector<1x1x8x128xf32>
    %68 = vector.shape_cast %67 : vector<1x1x8x128xf32> to vector<8x128xf32>
    %69 = vector.shape_cast %66 : vector<8x128xf32> to vector<1x1x8x128xf32>
    tpu.vector_store %arg8[%c0_27, %c0_28, %c0_29, %c0_30], %69 {strides = array<i32>} : memref<1x1x8x128xf32, #tpu.memory_space<vmem>>, vector<1x1x8x128xf32>,
    return
  }
  func.func @transform_0(%arg0: i32, %arg1: i32) -> (i32, i32, i32, i32, i32) {
    %c0_i32 = arith.constant 0 : i32
    %c0_i32_0 = arith.constant 0 : i32
    %c0_i32_1 = arith.constant 0 : i32
    %c0_i32_2 = arith.constant 0 : i32
    return %arg0, %arg1, %c0_i32, %c0_i32_0, %c0_i32_1 : i32, i32, i32, i32, i32
  }
  func.func @transform_1(%arg0: i32, %arg1: i32) -> (i32, i32, i32, i32, i32) {
    %c0_i32 = arith.constant 0 : i32
    %c0_i32_0 = arith.constant 0 : i32
    %c0_i32_1 = arith.constant 0 : i32
    %c0_i32_2 = arith.constant 0 : i32
    return %arg0, %arg1, %c0_i32, %c0_i32_0, %c0_i32_1 : i32, i32, i32, i32, i32
  }
  func.func @transform_2(%arg0: i32, %arg1: i32) -> (i32, i32) {
    %c0_i32 = arith.constant 0 : i32
    %c0_i32_0 = arith.constant 0 : i32
    %c0_i32_1 = arith.constant 0 : i32
    return %c0_i32, %c0_i32_0 : i32, i32
  }
  func.func @transform_3(%arg0: i32, %arg1: i32) -> (i32, i32) {
    %c0_i32 = arith.constant 0 : i32
    %c0_i32_0 = arith.constant 0 : i32
    %c0_i32_1 = arith.constant 0 : i32
    return %c0_i32, %c0_i32_0 : i32, i32
  }
  func.func @transform_4(%arg0: i32, %arg1: i32) -> (i32, i32) {
    %c0_i32 = arith.constant 0 : i32
    %c0_i32_0 = arith.constant 0 : i32
    %c0_i32_1 = arith.constant 0 : i32
    return %c0_i32, %c0_i32_0 : i32, i32
  }
  func.func @transform_5(%arg0: i32, %arg1: i32) -> (i32, i32) {
    %c0_i32 = arith.constant 0 : i32
    %c0_i32_0 = arith.constant 0 : i32
    %c0_i32_1 = arith.constant 0 : i32
    return %c0_i32, %c0_i32_0 : i32, i32
  }
  func.func @transform_6(%arg0: i32, %arg1: i32) -> (i32, i32, i32, i32) {
    %c0_i32 = arith.constant 0 : i32
    %c0_i32_0 = arith.constant 0 : i32
    %c0_i32_1 = arith.constant 0 : i32
    return %arg0, %arg1, %c0_i32, %c0_i32_0 : i32, i32, i32, i32
  }
}

</mosaic_0001>

<bundles_post_ra>
// kernel: _lambda_.1
= control target key start
LH: loop header
LB: loop body
LE: loop exit
PB: predicated region body
PF: predicated region fallthrough
CT: control target
= control target key end

     0   :  { %s855_s21 = smov 0   ;;  %s857_s22 = smov 0   ;;  %s967_s0 = inlined_call_operand.vmem [shape: f32[2,2,1,10,72], index: 0, kind: input, shape index: {}]   ;;  %s968_s1 = inlined_call_operand.vmem [shape: f32[2,2,1,8,128], index: 1, kind: input, shape index: {}]   ;;  %s969_s2 = inlined_call_operand.vmem [shape: f32[9,64], index: 2, kind: input, shape index: {}]   ;;  %s970_s3 = inlined_call_operand.vmem [shape: f32[64,128], index: 3, kind: input, shape index: {}]   ;;  %s971_s4 = inlined_call_operand.vmem [shape: f32[1,128], index: 4, kind: input, shape index: {}]   ;;  %s972_s5 = inlined_call_operand.vmem [shape: f32[1,128], index: 5, kind: input, shape index: {}]   ;;  %s973_s6 = inlined_call_operand.vmem [shape: f32[2,2,8,128], index: 6, kind: output, shape index: {}]  }
   0x1   :  { %s859_s23 = smov 0   ;;  %s861_s24 = smov 0  }
   0x2   :  { %s863_s25 = smov 0  }
   0x3 LB: > { %s25_s26 = sadd.s32 1, %s803_s23  ;;  %s28_s27 = sadd.s32 1, %s807_s24  ;;  %s811_s25 = sphi %s863_s25, %s16_s25   ;;  %s807_s24 = sphi %s861_s24, %s977_s24   ;;  %s803_s23 = sphi %s859_s23, %s976_s23   ;;  %s799_s22 = sphi %s857_s22, %s975_s22   ;;  %s795_s21 = sphi %s855_s21, %s974_s21  }
   0x4   : > { %p26_p0 = scmp.ge.s32.totalorder %s25_s26, 2  ;;  %p672_p1 = scmp.ge.s32.totalorder %s811_s25, 1 }
   0x5   : > { %p247_p2 = scmp.lt.s32.totalorder %s811_s25, 5 }
   0x6   : > { %s979_s26 = smov (%p26_p0, %s25_s26), 0  ;;  %s981_s27 = smov (!%p26_p0, %s28_s27), %s807_s24 }
   0x7   : > { %p248_p3 = pnand %p672_p1, %p247_p2  ;;  %p30_p4 = scmp.ge.s32.totalorder %s981_s27, 2 }
   0x8   : > { %v321_v0 = vlaneseq (!%p248_p3)  ;;  %v317_v2 = vld [vmem:[%s969_s2] sm:$0xff] (!%p248_p3)  ;;  %s813_s30 = smov (!%p248_p3), 4   ;;  %v463_v13 = vld [vmem:[%s970_s3 + $0x8] sm:$0xff] (!%p248_p3)  ;;  %v814_v14 = vmov (!%p248_p3), 0.0|0.0   ;;  %s815_s11 = smov (!%p248_p3), 8   ;;  %vm335_vm0 = vcmask (!%p248_p3), 1046528  }
   0x9   : > { %s983_s27 = smov (%p30_p4, %s981_s27), 0  ;;  %251 = sbr.rel (%p248_p3) target bundleno = 484 (0x1e4), region = 44 }
   0xa   : > { %v322_v1 = vshrl.u32 (!%p248_p3), %v321_v0, 7  ;;  %v462_v12 = vld [vmem:[%s970_s3] sm:$0xff] (!%p248_p3)  ;;  %714 = vmatprep.subr.bf16.mxu0 (!%p248_p3), %v814_v14  ;;  %v680_v17 = vld [vmem:[%s969_s2 + $0x8] ss:$0 sm:$0xff] (!%p248_p3)  ;;  %p292_p5 = scmp.lt.s32.totalorder (!%p248_p3), %s799_s22, 1  ;;  %p294_p6 = scmp.lt.s32.totalorder (!%p248_p3), %s795_s21, 1 }
   0xb   : > { %v715_v15 = vpack.c.bf16 (!%p248_p3), %v463_v13, %v462_v12  ;;  %vm349_vm1 = vcmask (!%p248_p3), 1045504   ;;  %v464_v39 = vld [vmem:[%s970_s3 + $0x10] sm:$0xff] (!%p248_p3)  ;;  %v465_v40 = vld [vmem:[%s970_s3 + $0x18] sm:$0xff] (!%p248_p3)  ;;  %v466_v42 = vld [vmem:[%s970_s3 + $0x20] sm:$0xff] (!%p248_p3)  ;;  %vm816_vm2 = vmmov (!%p248_p3), 0   ;;  %v817_v60 = vmov (!%p248_p3), 0.0  }
   0xc   : > { %v371_v3 = vsub.s32 (!%p248_p3), 4, %v322_v1  ;;  %v390_v4 = vsub.s32 (!%p248_p3), 7, %v322_v1  ;;  %v357_v5 = vsub.s32 (!%p248_p3), 1, %v322_v1  ;;  %v423_v6 = vsub.s32 (!%p248_p3), 5, %v322_v1  ;;  %v467_v43 = vld [vmem:[%s970_s3 + $0x28] sm:$0xff] (!%p248_p3)  ;;  %v468_v47 = vld [vmem:[%s970_s3 + $0x30] sm:$0xff] (!%p248_p3)  ;;  %711 = vmatprep.mubr.msk.f32.mxu0 (!%p248_p3), %vm816_vm2, %v817_v60 }
   0xd   : > { %v409_v11 = vsub.s32 (!%p248_p3), 2, %v322_v1  ;;  %716 = vmatpush3.bf16.msra.mxu0 (!%p248_p3), %v715_v15  ;;  %v329_v18 = vsub.s32 (!%p248_p3), 3, %v322_v1  ;;  %v343_v20 = vsub.s32 (!%p248_p3), 6, %v322_v1  ;;  %v323_v23 = vsub.s32 (!%p248_p3), 0, %v322_v1  ;;  %v469_v48 = vld [vmem:[%s970_s3 + $0x38] sm:$0xff] (!%p248_p3) }
   0xe   : > { %v372_v7 = vrot.slane (!%p248_p3), %v317_v2, %v371_v3  ;;  %v391_v8 = vrot.slane (!%p248_p3), %v317_v2, %v390_v4  ;;  %v358_v9 = vrot.slane (!%p248_p3), %v317_v2, %v357_v5  ;;  %v424_v10 = vrot.slane (!%p248_p3), %v317_v2, %v423_v6  ;;  %717 = vmatprep.subr.bf16.mxu0 (!%p248_p3), %v814_v14 }
   0xf   : > { %v410_v16 = vrot.slane (!%p248_p3), %v317_v2, %v409_v11  ;;  %v330_v19 = vrot.slane (!%p248_p3), %v317_v2, %v329_v18  ;;  %v344_v25 = vrot.slane (!%p248_p3), %v317_v2, %v343_v20  ;;  %v324_v27 = vrot.slane (!%p248_p3), %v317_v2, %v323_v23 }
  0x10   : > { %374 = vrot.lane.b32.xlu0 %v372_v7, %s813_s30  ;;  %393 = vrot.lane.b32.xlu1 %v391_v8, %s813_s30  ;;  %s985_s22 = smov (!%p292_p5, %s799_s22), 1  ;;  %s987_s21 = smov (!%p294_p6, %s795_s21), 1  ;;  %v718_v41 = vpack.c.bf16 %v465_v40, %v464_v39  ;;  %v721_v44 = vpack.c.bf16 %v467_v43, %v466_v42  ;;  %v724_v53 = vpack.c.bf16 %v469_v48, %v468_v47  ;;  %vm476_vm3 = vcmask 523264  }
  0x11   : > { %s673_s14 = sshll.u32 %s987_s21, 1  ;;  %s674_s15 = sshll.u32 %s985_s22, 2 }
  0x12   : > { %s298_s16 = sadd.s32 %s674_s15, %s673_s14  ;;  %719 = vmatpush3.bf16.msra.mxu0 %v718_v41  ;;  %s676_s18 = sshll.u32 %s985_s22, 1 }
  0x13   : > { %s675_s17 = sshll.u32 %s298_s16, 3  ;;  %720 = vmatprep.subr.bf16.mxu0 %v814_v14  ;;  %s818_s16 = smov 124  }
  0x14   : > { %360 = vrot.lane.b32.xlu0 %v358_v9, %s813_s30  ;;  %426 = vrot.lane.b32.xlu1 %v424_v10, %s815_s11  ;;  %s300_s20 = scalar_lea.vmem %s967_s0, %s675_s17  ;;  %s819_s17 = smov 120  }
  0x15   : > { %v319_v21 = vld [vmem:[%s300_s20] sm:$0xff]  ;;  %v320_v22 = vld [vmem:[%s300_s20 + $0x8] sm:$0x3]  ;;  %s306_s19 = sadd.s32 %s676_s18, %s987_s21 }
  0x16   : > { %v332_v24 = vmul.f32 %v330_v19, %v320_v22  ;;  %v331_v26 = vmul.f32 %v330_v19, %v319_v21  ;;  %v346_v29 = vmul.f32 %v344_v25, %v320_v22  ;;  %v345_v31 = vmul.f32 %v344_v25, %v319_v21  ;;  %722 = vmatpush3.bf16.msra.mxu0 %v721_v44  ;;  %s677_s20 = sshll.u32 %s306_s19, 3  ;;  %v681_v25 = vld [vmem:[%s971_s4] ss:$0 sm:$0xff] }
  0x17   : > { %v325_v32 = vmul.f32 %v324_v27, %v319_v21  ;;  %723 = vmatprep.subr.bf16.mxu0 %v814_v14  ;;  %s308_s30 = scalar_lea.vmem %s968_s1, %s677_s20 }
  0x18   : > { %412 = vrot.lane.b32.xlu0 %v410_v16, %s815_s11  ;;  %445 = vrot.lane.b32.xlu1 %v680_v17, %s815_s11  ;;  %v337_v28 = vrot.slane %v332_v24, 1  ;;  %v336_v30 = vrot.slane %v331_v26, 1  ;;  %v351_v33 = vrot.slane %v346_v29, 2  ;;  %v350_v35 = vrot.slane %v345_v31, 2  ;;  %v459_v26 = vld [vmem:[%s308_s30] sm:$0xff]  ;;  %s316_s11 = scalar_lea.vmem %s973_s6, %s677_s20 }
  0x1a   : > { %v338_v34 = vsel %vm335_vm0, %v336_v30, %v337_v28  ;;  %v352_v37 = vsel %vm349_vm1, %v350_v35, %v351_v33  ;;  %725 = vmatpush3.bf16.msra.mxu0 %v724_v53  ;;  %v683_v30 = vld [vmem:[%s972_s5] ss:$0 sm:$0xff] }
  0x1b   : > { %v340_v36 = vadd.f32 %v338_v34, %v325_v32 }
  0x1d   : > { %v354_v38 = vadd.f32 %v352_v37, %v340_v36 }
  0x82   : > { %v375_v45 = vpop.permute.xlu0 %374  ;;  %v394_v46 = vpop.permute.xlu1 %393 }
  0x83   : > { %v377_v49 = vmul.f32 %v375_v45, %v319_v21  ;;  %v378_v50 = vmul.f32 %v375_v45, %v320_v22  ;;  %v396_v51 = vmul.f32 %v394_v46, %v319_v21  ;;  %v397_v52 = vmul.f32 %v394_v46, %v320_v22 }
  0x85   : > { %v381_v54 = vrot.slane %v377_v49, 1  ;;  %v382_v55 = vrot.slane %v378_v50, 1  ;;  %v400_v61 = vrot.slane %v396_v51, 2  ;;  %v401_v62 = vrot.slane %v397_v52, 2 }
  0x86   : > { %v361_v56 = vpop.permute.xlu0 %360  ;;  %v427_v57 = vpop.permute.xlu1 %426 }
  0x87   : > { %v363_v58 = vmul.f32 %v361_v56, %v319_v21  ;;  %v383_v59 = vsel %vm335_vm0, %v381_v54, %v382_v55  ;;  %v429_v63 = vmul.f32 %v427_v57, %v319_v21  ;;  %v430_v0 = vmul.f32 %v427_v57, %v320_v22 }
  0x88   : > { %384 = vrot.lane.b32.xlu1 %v383_v59, %s818_s16  ;;  %v402_v8 = vsel %vm349_vm1, %v400_v61, %v401_v62 }
  0x89   : > { %365 = vrot.lane.b32.xlu0 %v363_v58, %s818_s16  ;;  %v433_v6 = vrot.slane %v429_v63, 1  ;;  %v434_v7 = vrot.slane %v430_v0, 1 }
  0x8a   : > { %v413_v1 = vpop.permute.xlu0 %412  ;;  %v446_v2 = vpop.permute.xlu1 %445 }
  0x8b   : > { %v415_v3 = vmul.f32 %v413_v1, %v319_v21  ;;  %v448_v4 = vmul.f32 %v446_v2, %v319_v21  ;;  %v449_v5 = vmul.f32 %v446_v2, %v320_v22  ;;  %v435_v12 = vsel %vm335_vm0, %v433_v6, %v434_v7 }
  0x8d   : > { %v452_v9 = vrot.slane %v448_v4, 2  ;;  %v453_v10 = vrot.slane %v449_v5, 2  ;;  %403 = vrot.lane.b32.xlu0 %v402_v8, %s818_s16  ;;  %417 = vrot.lane.b32.xlu1 %v415_v3, %s819_s17 }
  0x8f   : > { %v454_v11 = vsel %vm349_vm1, %v452_v9, %v453_v10 }
  0x91   : > { %436 = vrot.lane.b32.xlu0 %v435_v12, %s819_s17  ;;  %455 = vrot.lane.b32.xlu1 %v454_v11, %s819_s17 }
  0xfa   : > { %v385_v13 = vpop.permute.xlu1 %384 }
  0xfb   : > { %v366_v14 = vpop.permute.xlu0 %365 }
  0xfc   : > { %v368_v15 = vadd.f32 %v366_v14, %v354_v38 }
  0xfe   : > { %v387_v16 = vadd.f32 %v385_v13, %v368_v15 }
  0xff   : > { %v404_v17 = vpop.permute.xlu0 %403  ;;  %v418_v18 = vpop.permute.xlu1 %417 }
 0x100   : > { %v406_v19 = vadd.f32 %v404_v17, %v387_v16 }
 0x102   : > { %v420_v20 = vadd.f32 %v418_v18, %v406_v19 }
 0x103   : > { %v437_v21 = vpop.permute.xlu0 %436  ;;  %v456_v22 = vpop.permute.xlu1 %455 }
 0x104   : > { %v439_v23 = vadd.f32 %v437_v21, %v420_v20 }
 0x106   : > { %v458_v24 = vadd.f32 %v456_v22, %v439_v23 }
 0x108   : > { %712 = vmatmul.mubr.msk.f32.vlgmr.msra.gmra.mrb[0].mxu0 %vm476_vm3, %v458_v24 }
 0x1db   : > { %v546_v27 = vpop.f32.mrb[0].mxu0 }
 0x1dc   : > { %v547_v28 = vadd.f32 %v681_v25, %v546_v27  ;;  %v713_v29 = vpop.f32.mrb[1].mxu0 }
 0x1de   : > { %v550_v31 = vadd.f32 %v547_v28, %v459_v26 }
 0x1e0   : > { %vm551_vm4 = vcmp.ge.f32.partialorder %v550_v31, 0.0  ;;  %v558_v32 = vmul.f32 %v683_v30, %v550_v31 }
 0x1e2   : > { %v559_v33 = vsel %vm551_vm4, %v550_v31, %v558_v32 }
 0x1e3   : > { %560 = vst [vmem:[%s316_s11] sm:$0xff] %v559_v33 }
 0x1e4 PF: > { %s16_s25 = sadd.s32 1, %s811_s25   ;;  %s974_s21 = smov %s803_s23 }
 0x1e5   : > { %p13_p7 = scmp.ge.s32.totalorder %s16_s25, 6   ;;  %s975_s22 = smov %s807_s24 }
 0x1e6   : > { %s976_s23 = smov %s979_s26  ;;  %s977_s24 = smov %s983_s27 }
 0x1e7   :  { %15 = sbr.rel (!%p13_p7) target bundleno = 3 (0x3), region = 77 }

</bundles_post_ra>
